<compile_context>
chip_gen: v7x
topology: tpu7x:2x2x1
jax: 0.10.0
libtpu: 0.0.40
codegen_flags: <defaults>
</compile_context>

<pallas_src>
import functools

import jax
import jax.numpy as jnp
from jax.experimental import pallas as pl
from jax.experimental.pallas import tpu as pltpu


def _cdiv(a, b):
    return (a + b - 1) // b


def _round_up(x, m):
    return ((x + m - 1) // m) * m


# ----------------------------------------------------------------------------
# Pallas kernel: one (head, row-tile) grid step of the fused 3-layer MLP.
# ----------------------------------------------------------------------------
def _heads_kernel(x_ref, w1_ref, t1_ref, w2_ref, t2_ref, w3_ref, b3_ref,
                  o_ref, *, acts):
    # x is already bf16 (wrapper-side cast) -> straight into the MXU.
    x = x_ref[...]

    # fc1 + folded BatchNorm1d (eval; scale folded into w1) + ReLU
    h1 = jnp.dot(x, w1_ref[...], preferred_element_type=jnp.float32)
    h1 = jnp.maximum(h1 + t1_ref[...], 0.0)

    # fc2 + folded BatchNorm1d (eval) + ReLU   (Dropout == identity in eval)
    h2 = jnp.dot(h1.astype(jnp.bfloat16), w2_ref[...],
                 preferred_element_type=jnp.float32)
    h2 = jnp.maximum(h2 + t2_ref[...], 0.0)

    # fc3 (class dim padded to a multiple of 128 for lane-dense stores)
    logits = jnp.dot(h2.astype(jnp.bfloat16), w3_ref[...],
                     preferred_element_type=jnp.float32)
    logits = logits + b3_ref[...]

    def epilogue(act):
        if act == "log_softmax":
            # Padded class columns carry bias -1e30 -> exp underflows to 0 in
            # f32, so the normalizer only sees the valid columns.
            m = jnp.max(logits, axis=-1, keepdims=True)
            z = logits - m
            lse = jnp.log(jnp.sum(jnp.exp(z), axis=-1, keepdims=True))
            return z - lse
        if act == "sigmoid":
            # Exact sigmoid via a single EUP tanh; stays inside [0, 1].
            return 0.5 * jnp.tanh(0.5 * logits) + 0.5
        return logits

    if len(set(acts)) == 1:
        o_ref[...] = epilogue(acts[0]).astype(o_ref.dtype)
    else:
        head = pl.program_id(0)
        for idx, act in enumerate(acts):
            @pl.when(head == idx)
            def _(act=act):
                o_ref[...] = epilogue(act).astype(o_ref.dtype)


# ----------------------------------------------------------------------------
# Wrapper: runs several classifier heads that share layer shapes in ONE
# pallas_call.  Grid = (head, row_tile); params are indexed by head only
# (DMA'd once per head since the row-tile axis is the inner grid axis).
# ----------------------------------------------------------------------------
def run_heads(feats_list, params_list, acts, n_cls_list, *,
              tn=512, out_dtype=jnp.bfloat16):
    n_heads = len(feats_list)
    assert n_heads == len(params_list) == len(acts) == len(n_cls_list)
    n_rows = [f.shape[0] for f in feats_list]
    n_max = max(n_rows)
    if n_max == 0:  # no objects / edges in the frame: nothing to launch
        return [jnp.zeros((0, c), out_dtype) for c in n_cls_list]

    d_in = feats_list[0].shape[1]

    # Balanced row tiling: pick the tile count first, then the per-tile row
    # count (rounded to 16 so bf16 LHS vregs feeding the MXU are fully
    # packed).  N just above `tn` no longer pads up to 2*tn.
    num_tiles = _cdiv(n_max, tn)
    if n_max >= 64 and n_heads * num_tiles < 2:
        num_tiles = 2  # keep both v7x TensorCores busy on the parallel grid
    tn_eff = _round_up(_cdiv(n_max, num_tiles), 16)
    n_pad = num_tiles * tn_eff

    # Stack features across heads; bf16 wrapper-side cast halves HBM->VMEM
    # bytes of the only pipelined operand and drops the in-kernel VPU cast.
    x = jnp.stack([
        jnp.pad(f.astype(jnp.bfloat16), ((0, n_pad - f.shape[0]), (0, 0)))
        for f in feats_list])                                  # (H, n_pad, D)

    w1 = jnp.stack([p[0] for p in params_list])                # (H, D,  H1) bf16
    t1 = jnp.stack([p[1] for p in params_list])                # (H, 1,  H1) f32
    w2 = jnp.stack([p[2] for p in params_list])                # (H, H1, H2) bf16
    t2 = jnp.stack([p[3] for p in params_list])                # (H, 1,  H2) f32
    w3 = jnp.stack([p[4] for p in params_list])                # (H, H2, Kp) bf16
    b3 = jnp.stack([p[5] for p in params_list])                # (H, 1,  Kp) f32
    h1_dim, h2_dim, k_pad = w1.shape[2], w2.shape[2], w3.shape[2]

    def per_head(shape):
        # Parameter blocks: indexed only by the head axis (constant across
        # row tiles -> fetched once per head, VMEM-resident while used).
        return pl.BlockSpec((None,) + shape,
                            lambda h, i: (h,) + (0,) * len(shape))

    out = pl.pallas_call(
        functools.partial(_heads_kernel, acts=tuple(acts)),
        out_shape=jax.ShapeDtypeStruct((n_heads, n_pad, k_pad), out_dtype),
        grid_spec=pltpu.PrefetchScalarGridSpec(
            num_scalar_prefetch=0,
            grid=(n_heads, num_tiles),
            in_specs=[
                pl.BlockSpec((None, tn_eff, d_in), lambda h, i: (h, i, 0)),
                per_head((d_in, h1_dim)),   # w1 (BN scale folded in)
                per_head((1, h1_dim)),      # t1 (f32 shift)
                per_head((h1_dim, h2_dim)), # w2
                per_head((1, h2_dim)),      # t2
                per_head((h2_dim, k_pad)),  # w3 (lane-padded)
                per_head((1, k_pad)),       # b3 (lane-padded)
            ],
            out_specs=pl.BlockSpec((None, tn_eff, k_pad),
                                   lambda h, i: (h, i, 0)),
        ),
        compiler_params=pltpu.CompilerParams(
            dimension_semantics=("parallel", "parallel")),
    )(x, w1, t1, w2, t2, w3, b3)

    # Strip row padding and the lane padding of the class dimension.
    return [out[hi, :n, :c]
            for hi, (n, c) in enumerate(zip(n_rows, n_cls_list))]


# ----------------------------------------------------------------------------
# Deterministic parameter construction (Linear + BatchNorm folded, bf16
# matmul weights, class dim padded to k_pad lanes).
# ----------------------------------------------------------------------------
def make_head_params(key, d_in, h1, h2, n_cls, *, k_pad=None, pad_bias=0.0,
                     eps=1e-5):
    if k_pad is None:
        k_pad = _round_up(n_cls, 128)
    ks = jax.random.split(key, 6)

    def linear(k, din, dout):
        kw, kb = jax.random.split(k)
        w = jax.random.normal(kw, (din, dout), jnp.float32) / jnp.sqrt(din)
        b = jax.random.normal(kb, (dout,), jnp.float32) * 0.01
        return w, b

    def bn(k, dim):
        kg, kb, km, kv = jax.random.split(k, 4)
        gamma = 1.0 + 0.1 * jax.random.normal(kg, (dim,), jnp.float32)
        beta = 0.1 * jax.random.normal(kb, (dim,), jnp.float32)
        mean = 0.1 * jax.random.normal(km, (dim,), jnp.float32)
        var = jnp.abs(jax.random.normal(kv, (dim,), jnp.float32)) + 0.5
        return gamma, beta, mean, var

    def fold(w, b, gamma, beta, mean, var):
        # BN(eval) after Linear: y = gamma*(x@W + b - mean)/sqrt(var+eps)+beta
        scale = gamma / jnp.sqrt(var + eps)
        w_f = (w * scale[None, :]).astype(jnp.bfloat16)
        shift = (beta + scale * (b - mean)).reshape(1, -1)
        return w_f, shift

    w1, b1 = linear(ks[0], d_in, h1)
    w1f, t1 = fold(w1, b1, *bn(ks[1], h1))

    w2, b2 = linear(ks[2], h1, h2)
    w2f, t2 = fold(w2, b2, *bn(ks[3], h2))

    w3, b3 = linear(ks[4], h2, n_cls)
    w3p = jnp.zeros((h2, k_pad), jnp.float32).at[:, :n_cls].set(w3)
    w3p = w3p.astype(jnp.bfloat16)
    b3p = jnp.full((1, k_pad), pad_bias, jnp.float32).at[0, :n_cls].set(b3)

    return (w1f, t1, w2f, t2, w3p, b3p)


# ----------------------------------------------------------------------------
# Module-level forward: (obj_feats, edge_feats) -> (obj_pred, rel_pred)
# ----------------------------------------------------------------------------
def bfeat_finetuning_class_head_forward(obj_feats, edge_feats,
                                        obj_params, rel_params,
                                        n_obj_cls, n_rel_cls):
    # obj_feats / edge_feats stand in for the frozen backbone's detached
    # outputs (_obj_feats, _edge_feats).
    fuseable = (obj_feats.ndim == 2 and edge_feats.ndim == 2
                and obj_feats.shape[1] == edge_feats.shape[1]
                and all(a.shape == b.shape and a.dtype == b.dtype
                        for a, b in zip(obj_params, rel_params)))
    if fuseable:
        obj_pred, rel_pred = run_heads(
            [obj_feats, edge_feats], [obj_params, rel_params],
            ("log_softmax", "sigmoid"), (n_obj_cls, n_rel_cls))
    else:
        # Fallback when the two heads have different layer shapes.
        (obj_pred,) = run_heads([obj_feats], [obj_params],
                                ("log_softmax",), (n_obj_cls,))
        (rel_pred,) = run_heads([edge_feats], [rel_params],
                                ("sigmoid",), (n_rel_cls,))
    return obj_pred, rel_pred


if __name__ == "__main__":
    key = jax.random.PRNGKey(0)
    k_obj, k_edge, k_pobj, k_prel = jax.random.split(key, 4)

    # Small shapes consistent with the module's forward semantics.
    N_OBJ, N_EDGE = 16, 21          # number of objects / edges (21: ragged)
    DIM_OBJ = DIM_EDGE = 128        # m_config.dim_obj_feats / dim_edge_feats
    H1, H2 = 256, 128               # (512, 256 in the real model; scaled down)
    N_OBJ_CLS, N_REL_CLS = 16, 8

    obj_feats = jax.random.normal(k_obj, (N_OBJ, DIM_OBJ), jnp.float32)
    edge_feats = jax.random.normal(k_edge, (N_EDGE, DIM_EDGE), jnp.float32)

    # Shared lane padding so the two heads can be fused into one call.
    # log_softmax head: padded class columns get a very negative bias so they
    # do not perturb the normalizer. sigmoid head: padded bias 0 (sliced off).
    K_PAD = _round_up(max(N_OBJ_CLS, N_REL_CLS), 128)
    obj_params = make_head_params(k_pobj, DIM_OBJ, H1, H2, N_OBJ_CLS,
                                  k_pad=K_PAD, pad_bias=-1e30)
    rel_params = make_head_params(k_prel, DIM_EDGE, H1, H2, N_REL_CLS,
                                  k_pad=K_PAD, pad_bias=0.0)

    obj_pred, rel_pred = bfeat_finetuning_class_head_forward(
        obj_feats, edge_feats, obj_params, rel_params, N_OBJ_CLS, N_REL_CLS)
    jax.block_until_ready((obj_pred, rel_pred))

    # Pure-JAX reference check (same bf16 matmul operands, f32 accumulation).
    def ref_head(x, p, act, n_cls):
        w1, t1, w2, t2, w3, b3 = p
        bf = jnp.bfloat16
        h1 = jnp.maximum(
            jnp.dot(x.astype(bf), w1, preferred_element_type=jnp.float32) + t1,
            0.0)
        h2 = jnp.maximum(
            jnp.dot(h1.astype(bf), w2, preferred_element_type=jnp.float32) + t2,
            0.0)
        logits = jnp.dot(h2.astype(bf), w3,
                         preferred_element_type=jnp.float32) + b3
        logits = logits[:, :n_cls]
        if act == "log_softmax":
            return jax.nn.log_softmax(logits, axis=-1)
        return jax.nn.sigmoid(logits)

    ref_obj = ref_head(obj_feats, obj_params, "log_softmax", N_OBJ_CLS)
    ref_rel = ref_head(edge_feats, rel_params, "sigmoid", N_REL_CLS)

    assert obj_pred.shape == (N_OBJ, N_OBJ_CLS)
    assert rel_pred.shape == (N_EDGE, N_REL_CLS)
    # Tolerance covers bf16 matmul operands + bf16 output store.
    assert jnp.allclose(obj_pred.astype(jnp.float32), ref_obj,
                        atol=3e-2, rtol=3e-2)
    assert jnp.allclose(rel_pred.astype(jnp.float32), ref_rel,
                        atol=3e-2, rtol=3e-2)

    print("KERNEL_OK")
</pallas_src>

<mosaic_0001>
module attributes {stable_mosaic.version = 11 : i64} {
  func.func @_heads_kernel(%arg0: i32, %arg1: i32, %arg2: memref<1x32x128xbf16, #tpu.memory_space<vmem>>, %arg3: memref<1x128x256xbf16, #tpu.memory_space<vmem>>, %arg4: memref<1x1x256xf32, #tpu.memory_space<vmem>>, %arg5: memref<1x256x128xbf16, #tpu.memory_space<vmem>>, %arg6: memref<1x1x128xf32, #tpu.memory_space<vmem>>, %arg7: memref<1x128x128xbf16, #tpu.memory_space<vmem>>, %arg8: memref<1x1x128xf32, #tpu.memory_space<vmem>>, %arg9: memref<1x32x128xbf16, #tpu.memory_space<vmem>>) attributes {dimension_semantics = [#tpu.dimension_semantics<parallel>, #tpu.dimension_semantics<parallel>], iteration_bounds = array<i64: 2, 1>, scalar_prefetch = 0 : i64, scratch_operands = 0 : i64, tpu.core_type = #tpu.core_type<tc>, window_params = [{transform_indices = @transform_0, window_bounds = array<i64: 1, 32, 128>}, {transform_indices = @transform_1, window_bounds = array<i64: 1, 128, 256>}, {transform_indices = @transform_2, window_bounds = array<i64: 1, 1, 256>}, {transform_indices = @transform_3, window_bounds = array<i64: 1, 256, 128>}, {transform_indices = @transform_4, window_bounds = array<i64: 1, 1, 128>}, {transform_indices = @transform_5, window_bounds = array<i64: 1, 128, 128>}, {transform_indices = @transform_6, window_bounds = array<i64: 1, 1, 128>}, {transform_indices = @transform_7, window_bounds = array<i64: 1, 32, 128>}]} {
    %c0 = arith.constant 0 : index
    %c0_0 = arith.constant 0 : index
    %c0_1 = arith.constant 0 : index
    %0 = vector.load %arg2[%c0, %c0_0, %c0_1] : memref<1x32x128xbf16, #tpu.memory_space<vmem>>, vector<1x32x128xbf16>
    %1 = vector.shape_cast %0 : vector<1x32x128xbf16> to vector<32x128xbf16>
    %c0_2 = arith.constant 0 : index
    %c0_3 = arith.constant 0 : index
    %c0_4 = arith.constant 0 : index
    %2 = vector.load %arg3[%c0_2, %c0_3, %c0_4] : memref<1x128x256xbf16, #tpu.memory_space<vmem>>, vector<1x128x256xbf16>
    %3 = vector.shape_cast %2 : vector<1x128x256xbf16> to vector<128x256xbf16>
    %cst = arith.constant dense<0.000000e+00> : vector<32x256xf32>
    %4 = tpu.matmul %1, %3, %cst {dimension_numbers = #tpu.dot_dimension_numbers<[1], [0], [0], [1], [0, 0, 1, 1], [], []>} : vector<32x128xbf16>, vector<128x256xbf16>, vector<32x256xf32> -> vector<32x256xf32>
    %c0_5 = arith.constant 0 : index
    %c0_6 = arith.constant 0 : index
    %c0_7 = arith.constant 0 : index
    %5 = vector.load %arg4[%c0_5, %c0_6, %c0_7] : memref<1x1x256xf32, #tpu.memory_space<vmem>>, vector<1x1x256xf32>
    %6 = vector.shape_cast %5 : vector<1x1x256xf32> to vector<1x256xf32>
    %7 = vector.broadcast %6 : vector<1x256xf32> to vector<32x256xf32>
    %8 = arith.addf %4, %7 : vector<32x256xf32>
    %cst_8 = arith.constant 0.000000e+00 : f32
    %9 = vector.broadcast %cst_8 : f32 to vector<32x256xf32>
    %10 = arith.maximumf %8, %9 : vector<32x256xf32>
    %11 = arith.truncf %10 : vector<32x256xf32> to vector<32x256xbf16>
    %c0_9 = arith.constant 0 : index
    %c0_10 = arith.constant 0 : index
    %c0_11 = arith.constant 0 : index
    %12 = vector.load %arg5[%c0_9, %c0_10, %c0_11] : memref<1x256x128xbf16, #tpu.memory_space<vmem>>, vector<1x256x128xbf16>
    %13 = vector.shape_cast %12 : vector<1x256x128xbf16> to vector<256x128xbf16>
    %cst_12 = arith.constant dense<0.000000e+00> : vector<32x128xf32>
    %14 = tpu.matmul %11, %13, %cst_12 {dimension_numbers = #tpu.dot_dimension_numbers<[1], [0], [0], [1], [0, 0, 1, 1], [], []>} : vector<32x256xbf16>, vector<256x128xbf16>, vector<32x128xf32> -> vector<32x128xf32>
    %c0_13 = arith.constant 0 : index
    %c0_14 = arith.constant 0 : index
    %c0_15 = arith.constant 0 : index
    %15 = vector.load %arg6[%c0_13, %c0_14, %c0_15] : memref<1x1x128xf32, #tpu.memory_space<vmem>>, vector<1x1x128xf32>
    %16 = vector.shape_cast %15 : vector<1x1x128xf32> to vector<1x128xf32>
    %17 = vector.broadcast %16 : vector<1x128xf32> to vector<32x128xf32>
    %18 = arith.addf %14, %17 : vector<32x128xf32>
    %cst_16 = arith.constant 0.000000e+00 : f32
    %19 = vector.broadcast %cst_16 : f32 to vector<32x128xf32>
    %20 = arith.maximumf %18, %19 : vector<32x128xf32>
    %21 = arith.truncf %20 : vector<32x128xf32> to vector<32x128xbf16>
    %c0_17 = arith.constant 0 : index
    %c0_18 = arith.constant 0 : index
    %c0_19 = arith.constant 0 : index
    %22 = vector.load %arg7[%c0_17, %c0_18, %c0_19] : memref<1x128x128xbf16, #tpu.memory_space<vmem>>, vector<1x128x128xbf16>
    %23 = vector.shape_cast %22 : vector<1x128x128xbf16> to vector<128x128xbf16>
    %cst_20 = arith.constant dense<0.000000e+00> : vector<32x128xf32>
    %24 = tpu.matmul %21, %23, %cst_20 {dimension_numbers = #tpu.dot_dimension_numbers<[1], [0], [0], [1], [0, 0, 1, 1], [], []>} : vector<32x128xbf16>, vector<128x128xbf16>, vector<32x128xf32> -> vector<32x128xf32>
    %c0_21 = arith.constant 0 : index
    %c0_22 = arith.constant 0 : index
    %c0_23 = arith.constant 0 : index
    %25 = vector.load %arg8[%c0_21, %c0_22, %c0_23] : memref<1x1x128xf32, #tpu.memory_space<vmem>>, vector<1x1x128xf32>
    %26 = vector.shape_cast %25 : vector<1x1x128xf32> to vector<1x128xf32>
    %27 = vector.broadcast %26 : vector<1x128xf32> to vector<32x128xf32>
    %28 = arith.addf %24, %27 : vector<32x128xf32>
    %c0_i32 = arith.constant 0 : i32
    %29 = arith.cmpi eq, %arg0, %c0_i32 : i32
    %30 = arith.extui %29 : i1 to i32
    %c0_i32_24 = arith.constant 0 : i32
    %31 = arith.cmpi ne, %30, %c0_i32_24 : i32
    scf.if %31 {
      %cst_26 = arith.constant dense<0xFF800000> : vector<32xf32>
      %35 = vector.multi_reduction <maximumf>, %28, %cst_26 [1] : vector<32x128xf32> to vector<32xf32>
      %36 = vector.shape_cast %35 : vector<32xf32> to vector<32x1xf32>
      %37 = vector.broadcast %36 : vector<32x1xf32> to vector<32x128xf32>
      %38 = arith.subf %28, %37 : vector<32x128xf32>
      %39 = math.exp %38 : vector<32x128xf32>
      %cst_27 = arith.constant dense<0.000000e+00> : vector<32xf32>
      %40 = vector.multi_reduction <add>, %39, %cst_27 [1] : vector<32x128xf32> to vector<32xf32>
      %41 = vector.shape_cast %40 : vector<32xf32> to vector<32x1xf32>
      %42 = math.log %41 : vector<32x1xf32>
      %43 = vector.broadcast %42 : vector<32x1xf32> to vector<32x128xf32>
      %44 = arith.subf %38, %43 : vector<32x128xf32>
      %45 = arith.truncf %44 : vector<32x128xf32> to vector<32x128xbf16>
      %c0_28 = arith.constant 0 : index
      %c0_29 = arith.constant 0 : index
      %c0_30 = arith.constant 0 : index
      %46 = vector.load %arg9[%c0_28, %c0_29, %c0_30] : memref<1x32x128xbf16, #tpu.memory_space<vmem>>, vector<1x32x128xbf16>
      %47 = vector.shape_cast %46 : vector<1x32x128xbf16> to vector<32x128xbf16>
      %48 = vector.shape_cast %45 : vector<32x128xbf16> to vector<1x32x128xbf16>
      tpu.vector_store %arg9[%c0_28, %c0_29, %c0_30], %48 {strides = array<i32>} : memref<1x32x128xbf16, #tpu.memory_space<vmem>>, vector<1x32x128xbf16>,
    } else {
    }
    %c1_i32 = arith.constant 1 : i32
    %32 = arith.cmpi eq, %arg0, %c1_i32 : i32
    %33 = arith.extui %32 : i1 to i32
    %c0_i32_25 = arith.constant 0 : i32
    %34 = arith.cmpi ne, %33, %c0_i32_25 : i32
    scf.if %34 {
      %cst_26 = arith.constant 5.000000e-01 : f32
      %35 = vector.broadcast %cst_26 : f32 to vector<32x128xf32>
      %36 = arith.mulf %35, %28 : vector<32x128xf32>
      %37 = math.tanh %36 : vector<32x128xf32>
      %cst_27 = arith.constant 5.000000e-01 : f32
      %38 = vector.broadcast %cst_27 : f32 to vector<32x128xf32>
      %39 = arith.mulf %38, %37 : vector<32x128xf32>
      %cst_28 = arith.constant 5.000000e-01 : f32
      %40 = vector.broadcast %cst_28 : f32 to vector<32x128xf32>
      %41 = arith.addf %39, %40 : vector<32x128xf32>
      %42 = arith.truncf %41 : vector<32x128xf32> to vector<32x128xbf16>
      %c0_29 = arith.constant 0 : index
      %c0_30 = arith.constant 0 : index
      %c0_31 = arith.constant 0 : index
      %43 = vector.load %arg9[%c0_29, %c0_30, %c0_31] : memref<1x32x128xbf16, #tpu.memory_space<vmem>>, vector<1x32x128xbf16>
      %44 = vector.shape_cast %43 : vector<1x32x128xbf16> to vector<32x128xbf16>
      %45 = vector.shape_cast %42 : vector<32x128xbf16> to vector<1x32x128xbf16>
      tpu.vector_store %arg9[%c0_29, %c0_30, %c0_31], %45 {strides = array<i32>} : memref<1x32x128xbf16, #tpu.memory_space<vmem>>, vector<1x32x128xbf16>,
    } else {
    }
    return
  }
  func.func @transform_0(%arg0: i32, %arg1: i32) -> (i32, i32, i32) {
    %c0_i32 = arith.constant 0 : i32
    %c0_i32_0 = arith.constant 0 : i32
    return %arg0, %arg1, %c0_i32 : i32, i32, i32
  }
  func.func @transform_1(%arg0: i32, %arg1: i32) -> (i32, i32, i32) {
    %c0_i32 = arith.constant 0 : i32
    %c0_i32_0 = arith.constant 0 : i32
    %c0_i32_1 = arith.constant 0 : i32
    return %arg0, %c0_i32, %c0_i32_0 : i32, i32, i32
  }
  func.func @transform_2(%arg0: i32, %arg1: i32) -> (i32, i32, i32) {
    %c0_i32 = arith.constant 0 : i32
    %c0_i32_0 = arith.constant 0 : i32
    %c0_i32_1 = arith.constant 0 : i32
    return %arg0, %c0_i32, %c0_i32_0 : i32, i32, i32
  }
  func.func @transform_3(%arg0: i32, %arg1: i32) -> (i32, i32, i32) {
    %c0_i32 = arith.constant 0 : i32
    %c0_i32_0 = arith.constant 0 : i32
    %c0_i32_1 = arith.constant 0 : i32
    return %arg0, %c0_i32, %c0_i32_0 : i32, i32, i32
  }
  func.func @transform_4(%arg0: i32, %arg1: i32) -> (i32, i32, i32) {
    %c0_i32 = arith.constant 0 : i32
    %c0_i32_0 = arith.constant 0 : i32
    %c0_i32_1 = arith.constant 0 : i32
    return %arg0, %c0_i32, %c0_i32_0 : i32, i32, i32
  }
  func.func @transform_5(%arg0: i32, %arg1: i32) -> (i32, i32, i32) {
    %c0_i32 = arith.constant 0 : i32
    %c0_i32_0 = arith.constant 0 : i32
    %c0_i32_1 = arith.constant 0 : i32
    return %arg0, %c0_i32, %c0_i32_0 : i32, i32, i32
  }
  func.func @transform_6(%arg0: i32, %arg1: i32) -> (i32, i32, i32) {
    %c0_i32 = arith.constant 0 : i32
    %c0_i32_0 = arith.constant 0 : i32
    %c0_i32_1 = arith.constant 0 : i32
    return %arg0, %c0_i32, %c0_i32_0 : i32, i32, i32
  }
  func.func @transform_7(%arg0: i32, %arg1: i32) -> (i32, i32, i32) {
    %c0_i32 = arith.constant 0 : i32
    %c0_i32_0 = arith.constant 0 : i32
    return %arg0, %arg1, %c0_i32 : i32, i32, i32
  }
}

</mosaic_0001>

<bundles_post_ra>
// kernel: tpu_custom_call.1
= control target key start
LH: loop header
LB: loop body
LE: loop exit
PB: predicated region body
PF: predicated region fallthrough
CT: control target
= control target key end

     0   :  { %s2281_s0 = inlined_call_operand.hbm [shape: bf16[2,32,128], index: 0, kind: input, shape index: {}]   ;;  %s2282_s1 = inlined_call_operand.hbm [shape: bf16[2,128,256], index: 1, kind: input, shape index: {}]   ;;  %s2283_s2 = inlined_call_operand.vmem [shape: f32[2,1,256], index: 2, kind: input, shape index: {}]   ;;  %s2284_s3 = inlined_call_operand.hbm [shape: bf16[2,256,128], index: 3, kind: input, shape index: {}]   ;;  %s2285_s4 = inlined_call_operand.vmem [shape: f32[2,1,128], index: 4, kind: input, shape index: {}]   ;;  %s2286_s5 = inlined_call_operand.hbm [shape: bf16[2,128,128], index: 5, kind: input, shape index: {}]   ;;  %s2287_s6 = inlined_call_operand.vmem [shape: f32[2,1,128], index: 6, kind: input, shape index: {}]   ;;  %s2288_s7 = inlined_call_operand.hbm [shape: bf16[2,32,128], index: 7, kind: output, shape index: {}]  }
   0x1   :  { %2299 = sst [smem:[#allocation21_spill]] %s2282_s1 }
   0x2   :  { %12 = vsyncpa [#allocation3], 0 }
   0x3   :  { %14 = vsyncpa [#allocation3 + $0x1], 0 }
   0x4   :  { %15 = vsyncpa [#allocation6], 0 }
   0x5   :  { %17 = vsyncpa [#allocation6 + $0x1], 0 }
   0x6   :  { %18 = vsyncpa [#allocation9], 0 }
   0x7   :  { %20 = vsyncpa [#allocation9 + $0x1], 0 }
   0x8   :  { %21 = vsyncpa [#allocation4], 0 }
   0x9   :  { %23 = vsyncpa [#allocation4 + $0x1], 0  ;;  %s1879_s24 = smov 0   ;;  %s1881_s25 = smov 0  }
   0xa   :  { %s1883_s26 = smov 0   ;;  %s1885_s27 = smov 0  }
   0xb   :  { %s1887_s28 = smov 0   ;;  %s1889_s29 = smov 0  }
   0xc LB: > { %2300 = sst [smem:[#allocation15_spill]] %s1805_s24  ;;  %s1910_s30 = sadd.s32 4294967295, %s1825_s29   ;;  %s1825_s29 = sphi %s1889_s29, %s29_s29   ;;  %s1821_s28 = sphi %s1887_s28, %s2330_s28   ;;  %s1817_s27 = sphi %s1885_s27, %s2329_s27   ;;  %s1813_s26 = sphi %s1883_s26, %s2325_s26   ;;  %s1809_s25 = sphi %s1881_s25, %s2328_s25   ;;  %s1805_s24 = sphi %s1879_s24, %s2327_s24  }
   0xd   : > { %2301 = sst [smem:[#allocation16_spill]] %s1813_s26  ;;  %s1283_s8 = sadd.s32 4294967294, %s1825_s29  }
   0xe   : > { %2302 = sst [smem:[#allocation17_spill]] %s1825_s29  ;;  %s41_s9 = sadd.s32 1, %s1821_s28 }
   0xf   : > { %s50_s10 = sadd.s32 1, %s1813_s26  ;;  %p43_p0 = scmp.ge.s32.totalorder %s41_s9, 2 }
  0x10   : > { %p57_p1 = scmp.ne.s32.totalorder %s1813_s26, %s1809_s25  ;;  %p58_p2 = scmp.eq.s32.totalorder %s1825_s29, 0 }
  0x11   : > { %p63_p3 = scmp.ne.s32.totalorder %s1809_s25, %s1805_s24  ;;  %s2332_s9 = smov (%p43_p0, %s41_s9), 0 }
  0x12   : > { %2303 = sst [smem:[#allocation18_spill]] %s2332_s9  ;;  %p1922_p4 = por %p58_p2, %p57_p1 }
  0x13   : > { %p64_p5 = scmp.eq.s32.totalorder %s1910_s30, 0  ;;  %s45_s12 = ssub.s32 %s1821_s28, %s2332_s9 }
  0x14   : > { %p245_p6 = scmp.eq.s32.totalorder %s1910_s30, 1  ;;  %p48_p7 = scmp.eq.s32.totalorder %s45_s12, 0 }
  0x15   : > { %p1930_p8 = por %p64_p5, %p63_p3  ;;  %p251_p10 = scmp.eq.s32.totalorder %s1283_s8, 1 }
  0x16   : > { %p1934_p9 = por %p245_p6, %p57_p1  ;;  %p1484_p13 = scmp.lt.s32.totalorder %s1825_s29, 2 }
  0x17   : > { %s2305_s13 = scalar_select %p1930_p8, 1, 0 }
  0x18   : > { %s2306_s14 = scalar_select %p1934_p9, 1, 0 }
  0x19   : > { %s1939_s15 = scalar_select %p48_p7, %s1813_s26, %s50_s10  }
  0x1a   : > { %p1941_p11 = por %p251_p10, %p63_p3  ;;  %s1948_s17 = sand.u32 1, %s1813_s26  }
  0x1b   : > { %2307 = sst [smem:[#allocation19_spill]] %s1939_s15  ;;  %s294_s18 = sand.u32 1, %s1825_s29  }
  0x1c   : > { %s2308_s16 = scalar_select %p1941_p11, 1, 0 }
  0x1d   : > { %s2290_s19 = sshll.u32 %s1948_s17, 7  ;;  %p1954_p0 = pnand %p1484_p13, %p1922_p4 }
  0x1e   : > { %2309 = sst [smem:[#allocation20_spill]] %s2308_s16  ;;  %s2291_s21 = sshll.u32 %s1821_s28, 11 }
  0x1f   : > { %s2311_s1 = sld [smem:[#allocation21_spill]]  ;;  %s298_s10 = scalar_lea.vmem [#allocation5], %s2290_s19 }
  0x20   : > { %s305_s12 = sshll.u32 %s298_s10, 4  ;;  %s1970_s11 = scalar_lea.sflag [#allocation6], %s294_s18  ;;  %s1968_s12 = int_to_ptr.vmem [resolvable:$true] %s305_s12 }
  0x21   : > { %p1976_p2 = pneg %p1954_p0 }
  0x25   : > { %s1964_s8 = scalar_lea.hbm %s2311_s1, %s2291_s21  ;;  %s1620_s19 = scalar_lea.hbm %s2311_s1, 4096 }
  0x26   : > { %s1615_s9 = scalar_lea.hbm %s1964_s8, 2048  ;;  %p1621_p5 = scmp.lt.u32.totalorder %s1964_s8, %s2311_s1 }
  0x27   : > { %p1616_p1 = scmp.ne.s32.totalorder %s1964_s8, %s1615_s9  ;;  %p1622_p6 = scmp.lt.u32.totalorder %s1620_s19, %s1615_s9 }
  0x28   : > { %p1624_p10 = scmp.lt.u32.totalorder %s1615_s9, %s1964_s8 }
  0x29   : > { %p1618_p3 = pnand %p1976_p2, %p1616_p1  ;;  %p1623_p7 = por %p1622_p6, %p1621_p5 }
  0x2b   : > { %p1619_p4 = pneg %p1618_p3  ;;  %p1625_p13 = por %p1624_p10, %p1623_p7 }
  0x2d   : > { %p1626_p12 = pnand %p1625_p13, %p1619_p4 }
  0x2f   : > { %1629 = shalt.err (!%p1626_p12)
}
  0x30   : > { %s1630_s18 = scalar_lea.vmem %s1968_s12, 2048  ;;  %s1827_s22 = smov [#allocation5]  }
  0x31   : > { %p1631_p1 = scmp.ne.s32.totalorder %s1968_s12, %s1630_s18  ;;  %s1635_s23 = sshll.u32 %s1827_s22, 4  ;;  %s1636_s23 = int_to_ptr.vmem [resolvable:$false] %s1635_s23 }
  0x32   : > { %s1637_s21 = scalar_lea.vmem %s1636_s23, 4096  ;;  %p1638_p9 = scmp.lt.s32.totalorder %s1968_s12, %s1636_s23 }
  0x33   : > { %p1633_p3 = pnand %p1631_p1, %p1976_p2  ;;  %p1639_p8 = scmp.lt.s32.totalorder %s1637_s21, %s1630_s18 }
  0x35   : > { %p1634_p11 = pneg %p1633_p3  ;;  %p1640_p5 = por %p1639_p8, %p1638_p9 }
  0x37   : > { %p1641_p6 = pnand %p1640_p5, %p1634_p11 }
  0x39   : > { %1644 = shalt.err (!%p1641_p6)
}
  0x3a   : > { %s1828_s9 = smov 128   ;;  %s1829_s19 = smov 8  }
  0x3b   : > { %1473 = dma.hbm_to_vmem [thread:$0]  (!%p1954_p0), %s1964_s8, 2048, %s1968_s12, %s1970_s11, %s1828_s9, %s1828_s9, %s1829_s19  }
  0x3c   : > { %s2313_s10 = sshll.u32 %s1821_s28, 11  ;;  %s2314_s21 = sshll.u32 %s1948_s17, 7 }
  0x3d   : > { %s2005_s23 = scalar_lea.hbm %s2284_s3, %s2313_s10  ;;  %s326_s1 = scalar_lea.vmem [#allocation7], %s2314_s21 }
  0x3e   : > { %s333_s26 = sshll.u32 %s326_s1, 4  ;;  %p1298_p8 = scmp.ge.s32.totalorder %s1825_s29, 1  ;;  %s2010_s26 = int_to_ptr.vmem [resolvable:$true] %s333_s26 }
  0x3f   : > { %p374_p9 = scmp.lt.s32.totalorder %s1825_s29, 3  ;;  %s1286_s24 = sshll.u32 %s1948_s17, 4 }
  0x40   : > { %s1364_s8 = sshll.u32 %s1821_s28, 8  ;;  %s275_s1 = scalar_lea.vmem [#allocation2], %s1286_s24 }
  0x41   : > { %p2013_p11 = pnand %p1298_p8, %p374_p9  ;;  %s2022_s19 = scalar_lea.hbm %s2281_s0, %s1364_s8 }
  0x42   : > { %s284_s10 = sshll.u32 %s275_s1, 4  ;;  %s272_s18 = scalar_lea.sflag [#allocation3], %s1948_s17  ;;  %s2024_s10 = int_to_ptr.vmem [resolvable:$true] %s284_s10 }
  0x43   : > { %s2315_s16 = scalar_select %p2013_p11, 1, 0 }
  0x44   : > { %s1645_s22 = scalar_lea.hbm %s2022_s19, 256  ;;  %s1650_s12 = scalar_lea.hbm %s2281_s0, 512 }
  0x45   : > { %p1646_p12 = scmp.ne.s32.totalorder %s2022_s19, %s1645_s22  ;;  %p1651_p10 = scmp.lt.u32.totalorder %s2022_s19, %s2281_s0 }
  0x46   : > { %p1652_p13 = scmp.lt.u32.totalorder %s1650_s12, %s1645_s22  ;;  %p1654_p3 = scmp.lt.u32.totalorder %s1645_s22, %s2022_s19 }
  0x47   : > { %p1648_p4 = pnand %p1646_p12, %p1976_p2 }
  0x48   : > { %p1653_p1 = por %p1652_p13, %p1651_p10 }
  0x49   : > { %p1649_p7 = pneg %p1648_p4 }
  0x4a   : > { %p1655_p5 = por %p1654_p3, %p1653_p1 }
  0x4c   : > { %p1656_p6 = pnand %p1655_p5, %p1649_p7 }
  0x4e   : > { %1659 = shalt.err (!%p1656_p6)
}
  0x4f   : > { %s1660_s24 = scalar_lea.vmem %s2024_s10, 256  ;;  %s1830_s29 = smov [#allocation2]  }
  0x50   : > { %p1661_p8 = scmp.ne.s32.totalorder %s2024_s10, %s1660_s24  ;;  %s1665_s1 = sshll.u32 %s1830_s29, 4  ;;  %s1666_s1 = int_to_ptr.vmem [resolvable:$false] %s1665_s1 }
  0x51   : > { %s1667_s21 = scalar_lea.vmem %s1666_s1, 512  ;;  %p1668_p4 = scmp.lt.s32.totalorder %s2024_s10, %s1666_s1 }
  0x52   : > { %p1663_p9 = pnand %p1661_p8, %p1976_p2  ;;  %p1669_p11 = scmp.lt.s32.totalorder %s1667_s21, %s1660_s24 }
  0x54   : > { %p1664_p12 = pneg %p1663_p9  ;;  %p1670_p10 = por %p1669_p11, %p1668_p4 }
  0x56   : > { %p1671_p13 = pnand %p1670_p10, %p1664_p12 }
  0x58   : > { %1674 = shalt.err (!%p1671_p13)
}
  0x59   : > { %s1831_s22 = smov 64   ;;  %s1832_s12 = smov 4  }
  0x5a   : > { %1470 = dma.hbm_to_vmem [thread:$0]  (!%p1954_p0), %s2022_s19, 256, %s2024_s10, %s272_s18, %s1831_s22, %s1831_s22, %s1832_s12  }
  0x5b   : > { %s1675_s8 = scalar_lea.hbm %s2005_s23, 2048  ;;  %s1680_s29 = scalar_lea.hbm %s2284_s3, 4096 }
  0x5c   : > { %p1676_p11 = scmp.ne.s32.totalorder %s2005_s23, %s1675_s8  ;;  %p1681_p3 = scmp.lt.u32.totalorder %s2005_s23, %s2284_s3 }
  0x5d   : > { %p1682_p5 = scmp.lt.u32.totalorder %s1680_s29, %s1675_s8  ;;  %p1684_p8 = scmp.lt.u32.totalorder %s1675_s8, %s2005_s23 }
  0x5e   : > { %p1678_p7 = pnand %p1676_p11, %p1976_p2 }
  0x5f   : > { %p1683_p6 = por %p1682_p5, %p1681_p3 }
  0x60   : > { %p1679_p1 = pneg %p1678_p7 }
  0x61   : > { %p1685_p9 = por %p1684_p8, %p1683_p6 }
  0x63   : > { %p1686_p12 = pnand %p1685_p9, %p1679_p1 }
  0x65   : > { %1689 = shalt.err (!%p1686_p12)
}
  0x66   : > { %s1690_s19 = scalar_lea.vmem %s2010_s26, 2048  ;;  %s1833_s10 = smov [#allocation7]  }
  0x67   : > { %p1691_p4 = scmp.ne.s32.totalorder %s2010_s26, %s1690_s19  ;;  %s1695_s18 = sshll.u32 %s1833_s10, 4  ;;  %s1696_s18 = int_to_ptr.vmem [resolvable:$false] %s1695_s18 }
  0x68   : > { %s1697_s9 = scalar_lea.vmem %s1696_s18, 4096  ;;  %p1698_p11 = scmp.lt.s32.totalorder %s2010_s26, %s1696_s18 }
  0x69   : > { %p1693_p10 = pnand %p1691_p4, %p1976_p2  ;;  %p1699_p7 = scmp.lt.s32.totalorder %s1697_s9, %s1690_s19 }
  0x6b   : > { %p1694_p13 = pneg %p1693_p10  ;;  %p1700_p3 = por %p1699_p7, %p1698_p11 }
  0x6d   : > { %p1701_p5 = pnand %p1700_p3, %p1694_p13 }
  0x6f   : > { %1704 = shalt.err (!%p1701_p5)
}
  0x70   : > { %1476 = dma.hbm_to_vmem [thread:$0]  (!%p1954_p0), %s2005_s23, 2048, %s2010_s26, %s1970_s11, %s1831_s22, %s1831_s22, %s1832_s12  }
  0x71   : > { %s1295_s8 = sshll.u32 %s1948_s17, 6  ;;  %s1367_s24 = sshll.u32 %s1821_s28, 10 }
  0x72   : > { %s2083_s21 = scalar_lea.hbm %s2286_s5, %s1367_s24  ;;  %s353_s19 = scalar_lea.vmem [#allocation8], %s1295_s8 }
  0x73   : > { %s360_s10 = sshll.u32 %s353_s19, 4  ;;  %s350_s18 = scalar_lea.sflag [#allocation9], %s1948_s17  ;;  %s2085_s10 = int_to_ptr.vmem [resolvable:$true] %s360_s10 }
  0x74   : > { %s1705_s9 = scalar_lea.hbm %s2083_s21, 1024  ;;  %s1710_s23 = scalar_lea.hbm %s2286_s5, 2048 }
  0x75   : > { %p1706_p1 = scmp.ne.s32.totalorder %s2083_s21, %s1705_s9  ;;  %p1711_p9 = scmp.lt.u32.totalorder %s2083_s21, %s2286_s5 }
  0x76   : > { %p1712_p12 = scmp.lt.u32.totalorder %s1710_s23, %s1705_s9  ;;  %p1714_p10 = scmp.lt.u32.totalorder %s1705_s9, %s2083_s21 }
  0x77   : > { %p1708_p6 = pnand %p1706_p1, %p1976_p2 }
  0x78   : > { %p1713_p4 = por %p1712_p12, %p1711_p9 }
  0x79   : > { %p1709_p8 = pneg %p1708_p6 }
  0x7a   : > { %p1715_p13 = por %p1714_p10, %p1713_p4 }
  0x7c   : > { %p1716_p11 = pnand %p1715_p13, %p1709_p8 }
  0x7e   : > { %1719 = shalt.err (!%p1716_p11)
}
  0x7f   : > { %s1720_s8 = scalar_lea.vmem %s2085_s10, 1024  ;;  %s1834_s1 = smov [#allocation8]  }
  0x80   : > { %p1721_p7 = scmp.ne.s32.totalorder %s2085_s10, %s1720_s8  ;;  %s1725_s19 = sshll.u32 %s1834_s1, 4  ;;  %s1726_s19 = int_to_ptr.vmem [resolvable:$false] %s1725_s19 }
  0x81   : > { %s1727_s26 = scalar_lea.vmem %s1726_s19, 2048  ;;  %p1728_p1 = scmp.lt.s32.totalorder %s2085_s10, %s1726_s19 }
  0x82   : > { %p1723_p3 = pnand %p1721_p7, %p1976_p2  ;;  %p1729_p6 = scmp.lt.s32.totalorder %s1727_s26, %s1720_s8 }
  0x84   : > { %p1724_p5 = pneg %p1723_p3  ;;  %p1730_p9 = por %p1729_p6, %p1728_p1 }
  0x86   : > { %p1731_p12 = pnand %p1730_p9, %p1724_p5 }
  0x88   : > { %1734 = shalt.err (!%p1731_p12)
}
  0x89   : > { %1479 = dma.hbm_to_vmem [thread:$0]  (!%p1954_p0), %s2083_s21, 1024, %s2085_s10, %s350_s18, %s1831_s22, %s1831_s22, %s1832_s12  }
  0x8a   : > { %p2316_p2 = scmp.ne.s32.totalorder %s2315_s16, 0 }
  0x8b   : > { %s2117_s15 = sand.u32 (!%p2316_p2), 1, %s1809_s25   ;;  %p2317_p8 = scmp.ne.s32.totalorder (!%p2316_p2), %s2305_s13, 0 }
  0x8c   : > { %378 = sbr.rel (%p2316_p2) target bundleno = 1230 (0x4ce), region = 48  ;;  %s1299_s9 = sshll.u32 (!%p2316_p2), %s2117_s15, 4 }
  0x8d   : > { %s381_s20 = scalar_lea.sflag (!%p2316_p2), [#allocation3], %s2117_s15  ;;  %s2123_s11 = scalar_lea.vmem (!%p2316_p2), [#allocation2], %s1299_s9 }
  0x93   : > { %1788 = dma.done.wait (%p2317_p8), %s381_s20, 256  }
  0x94   : > { %1790 = vsyncadd (%p2317_p8), %s381_s20, 4294967040  ;;  %s389_s16 = sand.u32 1, %s1910_s30   ;;  %s1300_s17 = sshll.u32 %s2117_s15, 7 }
  0x95   : > { %s390_s22 = scalar_lea.sflag [#allocation6], %s389_s16  ;;  %s2131_s12 = scalar_lea.vmem [#allocation5], %s1300_s17 }
  0x96   : > { %1792 = dma.done.wait (%p2317_p8), %s390_s22, 4096  }
  0x97   : > { %1794 = vsyncadd (%p2317_p8), %s390_s22, 4294963200  ;;  %s1302_s21 = sshll.u32 %s2117_s15, 6  ;;  %s2138_s10 = scalar_lea.vmem [#allocation7], %s1300_s17 }
  0x98   : > { %s408_s18 = scalar_lea.sflag [#allocation9], %s2117_s15  ;;  %s2141_s23 = scalar_lea.vmem [#allocation8], %s1302_s21 }
  0x99   : > { %1796 = dma.done.wait (%p2317_p8), %s408_s18, 1024  }
  0x9a   : > { %1798 = vsyncadd (%p2317_p8), %s408_s18, 4294966272  ;;  %v1835_v0 = vmov 0   ;;  %v1541_v1 = vld [vmem:[%s2131_s12 + $0x4] ss:$8 sps:$4 sm:$0xff]   ;;  %v1543_v2 = vld [vmem:[%s2131_s12] ss:$8 sps:$4 sm:$0xff]   ;;  %v502_v38 = vlaneseq }
  0x9b   : > { %636 = vmatprep.mubr.bf16.mxu0 %v1835_v0  ;;  %604 = vmatprep.subr.bf16.mxu0 %v1541_v1  ;;  %v1544_v3 = vld [vmem:[%s2131_s12 + $0x14] ss:$8 sps:$4 sm:$0xff]   ;;  %v1546_v4 = vld [vmem:[%s2131_s12 + $0x10] ss:$8 sps:$4 sm:$0xff]   ;;  %v1547_v5 = vld [vmem:[%s2131_s12 + $0x24] ss:$8 sps:$4 sm:$0xff]  }
  0x9c   : > { %605 = vmatpush1.bf16.msra.mxu0 %v1543_v2  ;;  %v1549_v6 = vld [vmem:[%s2131_s12 + $0x20] ss:$8 sps:$4 sm:$0xff]   ;;  %v1550_v7 = vld [vmem:[%s2131_s12 + $0x34] ss:$8 sps:$4 sm:$0xff]   ;;  %v1552_v8 = vld [vmem:[%s2131_s12 + $0x30] ss:$8 sps:$4 sm:$0xff]  }
  0x9d   : > { %606 = vmatprep.subr.bf16.mxu0 %v1544_v3  ;;  %v1553_v9 = vld [vmem:[%s2131_s12 + $0x44] ss:$8 sps:$4 sm:$0xff]   ;;  %v1555_v10 = vld [vmem:[%s2131_s12 + $0x40] ss:$8 sps:$4 sm:$0xff]   ;;  %v1556_v12 = vld [vmem:[%s2131_s12 + $0x54] ss:$8 sps:$4 sm:$0xff]  }
  0x9e   : > { %v1567_v11 = vld [vmem:[%s2138_s10 + $0x40] sm:$0xff]   ;;  %v1569_v14 = vld [vmem:[%s2138_s10 + $0x48] sm:$0xff]   ;;  %v1571_v16 = vld [vmem:[%s2138_s10 + $0x50] sm:$0xff]   ;;  %p468_p0 = scmp.lt.s32.totalorder %s1817_s27, 1  ;;  %v503_v39 = vshrl.u32 %v502_v38, 7  ;;  %s2211_s17 = scalar_lea.vmem [#allocation10], %s1299_s9 }
  0x9f   : > { %v1568_v13 = vld [vmem:[%s2138_s10] sm:$0xff]   ;;  %1399 = vmatprep.subr.bf16.mxu1 %v1567_v11  ;;  %v1570_v15 = vld [vmem:[%s2138_s10 + $0x8] sm:$0xff]   ;;  %v1558_v17 = vld [vmem:[%s2131_s12 + $0x50] ss:$8 sps:$4 sm:$0xff]   ;;  %p1349_p4 = scmp.ne.s32.totalorder %s1817_s27, 0 }
  0xa0   : > { %607 = vmatpush1.bf16.msra.mxu0 %v1546_v4  ;;  %1400 = vmatpush3.bf16.msra.mxu1 %v1568_v13  ;;  %v1559_v18 = vld [vmem:[%s2131_s12 + $0x64] ss:$8 sps:$4 sm:$0xff]   ;;  %v1572_v19 = vld [vmem:[%s2138_s10 + $0x10] sm:$0xff]   ;;  %v1561_v20 = vld [vmem:[%s2131_s12 + $0x60] ss:$8 sps:$4 sm:$0xff]   ;;  %s2186_s30 = scalar_select %p468_p0, %s1817_s27, 1 }
  0xa1   : > { %608 = vmatprep.subr.bf16.mxu0 %v1547_v5  ;;  %1401 = vmatprep.subr.bf16.mxu1 %v1569_v14  ;;  %v1573_v21 = vld [vmem:[%s2138_s10 + $0x58] sm:$0xff]   ;;  %v1575_v24 = vld [vmem:[%s2138_s10 + $0x60] sm:$0xff]   ;;  %v1577_v27 = vld [vmem:[%s2138_s10 + $0x68] sm:$0xff]   ;;  %v504_v40 = vsub.s32 0, %v503_v39  ;;  %v508_v42 = vsub.s32 1, %v503_v39 }
  0xa2   : > { %v1562_v22 = vld [vmem:[%s2131_s12 + $0x74] ss:$8 sps:$4 sm:$0xff]   ;;  %v1564_v25 = vld [vmem:[%s2131_s12 + $0x70] ss:$8 sps:$4 sm:$0xff]   ;;  %v1576_v26 = vld [vmem:[%s2138_s10 + $0x20] sm:$0xff]   ;;  %s1304_s13 = sshll.u32 %s2186_s30, 1  ;;  %s474_s26 = scalar_lea.vmem %s2285_s4, %s2186_s30 }
  0xa3   : > { %v1574_v23 = vld [vmem:[%s2138_s10 + $0x18] sm:$0xff]   ;;  %v1565_v28 = vld [vmem:[%s2123_s11] sm:$0xff]   ;;  %v1578_v30 = vld [vmem:[%s2138_s10 + $0x28] sm:$0xff]   ;;  %s471_s8 = scalar_lea.vmem %s2283_s2, %s1304_s13  ;;  %s477_s16 = scalar_lea.vmem %s2287_s6, %s2186_s30 }
  0xa4   : > { %609 = vmatpush1.bf16.msra.mxu0 %v1549_v6  ;;  %1402 = vmatpush3.bf16.msra.mxu1 %v1570_v15  ;;  %v1566_v29 = vld [vmem:[%s2123_s11 + $0x8] sm:$0xff]   ;;  %v1579_v31 = vld [vmem:[%s2138_s10 + $0x70] sm:$0xff]   ;;  %v1583_v35 = vld [vmem:[%s2141_s23] sm:$0xff]  }
  0xa5   : > { %610 = vmatprep.subr.bf16.mxu0 %v1550_v7  ;;  %1403 = vmatprep.subr.bf16.mxu1 %v1571_v16  ;;  %v1580_v32 = vld [vmem:[%s2138_s10 + $0x30] sm:$0xff]   ;;  %v1581_v33 = vld [vmem:[%s2138_s10 + $0x78] sm:$0xff]   ;;  %v1584_v36 = vld [vmem:[%s2141_s23 + $0x8] sm:$0xff]  }
  0xa6   : > { %v1582_v34 = vld [vmem:[%s2138_s10 + $0x38] sm:$0xff]   ;;  %v1585_v37 = vld [vmem:[%s2141_s23 + $0x10] sm:$0xff]   ;;  %v500_v41 = vld [vmem:[%s471_s8] sm:$0x3] }
  0xa7   : > { %v505_v43 = vrot.slane %v500_v41, %v504_v40  ;;  %v509_v44 = vrot.slane %v500_v41, %v508_v42  ;;  %v1588_v11 = vld [vmem:[%s2141_s23 + $0x28] sm:$0xff]   ;;  %v1590_v13 = vld [vmem:[%s2141_s23 + $0x38] sm:$0xff]   ;;  %v1323_v15 = vld [vmem:[%s474_s26] ss:$0 sm:$0xff] }
  0xa8   : > { %611 = vmatpush1.bf16.msra.mxu0 %v1552_v8  ;;  %1404 = vmatpush3.bf16.msra.mxu1 %v1572_v19 }
  0xa9   : > { %612 = vmatprep.subr.bf16.mxu0 %v1553_v9  ;;  %1405 = vmatprep.subr.bf16.mxu1 %v1573_v21  ;;  %v1586_v9 = vld [vmem:[%s2141_s23 + $0x18] sm:$0xff]  }
  0xac   : > { %613 = vmatpush1.bf16.msra.mxu0 %v1555_v10  ;;  %1406 = vmatpush3.bf16.msra.mxu1 %v1574_v23  ;;  %v1587_v10 = vld [vmem:[%s2141_s23 + $0x20] sm:$0xff]  }
  0xad   : > { %614 = vmatprep.subr.bf16.mxu0 %v1556_v12  ;;  %1407 = vmatprep.subr.bf16.mxu1 %v1575_v24  ;;  %v1589_v12 = vld [vmem:[%s2141_s23 + $0x30] sm:$0xff]  }
  0xb0   : > { %615 = vmatpush1.bf16.msra.mxu0 %v1558_v17  ;;  %1408 = vmatpush3.bf16.msra.mxu1 %v1576_v26 }
  0xb1   : > { %616 = vmatprep.subr.bf16.mxu0 %v1559_v18  ;;  %1409 = vmatprep.subr.bf16.mxu1 %v1577_v27 }
  0xb4   : > { %617 = vmatpush1.bf16.msra.mxu0 %v1561_v20  ;;  %1410 = vmatpush3.bf16.msra.mxu1 %v1578_v30 }
  0xb5   : > { %618 = vmatprep.subr.bf16.mxu0 %v1562_v22  ;;  %1411 = vmatprep.subr.bf16.mxu1 %v1579_v31 }
  0xb8   : > { %619 = vmatpush1.bf16.msra.mxu0 %v1564_v25  ;;  %1412 = vmatpush3.bf16.msra.mxu1 %v1580_v32 }
  0xb9   : > { %1413 = vmatprep.subr.bf16.mxu1 %v1581_v33  ;;  %1437 = vmatprep.subr.bf16.mxu0 %v1583_v35 }
  0xbb   : > { %637 = vmatmul.mubr.bf16.vlgmr.msra.gmra.mrb[0].mxu0 %v1565_v28 }
  0xbc   : > { %646 = vmatprep.mubr.bf16.mxu0 %v1835_v0  ;;  %1414 = vmatpush3.bf16.msra.mxu1 %v1582_v34 }
  0xbd   : > { %1438 = vmatpush3.bf16.msra.mxu0 %v1583_v35 }
  0xbe   : > { %1439 = vmatprep.subr.bf16.mxu0 %v1584_v36 }
  0xc1   : > { %1440 = vmatpush3.bf16.msra.mxu0 %v1584_v36 }
  0xc2   : > { %1441 = vmatprep.subr.bf16.mxu0 %v1585_v37 }
  0xc3   : > { %647 = vmatmul.mubr.bf16.gmra.mrb[4].mxu0 %v1566_v29 }
  0xc5   : > { %1442 = vmatpush3.bf16.msra.mxu0 %v1585_v37  ;;  %v1340_v37 = vld [vmem:[%s477_s16] ss:$0 sm:$0xff] }
  0xc6   : > { %1443 = vmatprep.subr.bf16.mxu0 %v1586_v9 }
  0xc9   : > { %1444 = vmatpush3.bf16.msra.mxu0 %v1586_v9 }
  0xca   : > { %1445 = vmatprep.subr.bf16.mxu0 %v1587_v10 }
  0xcd   : > { %1446 = vmatpush3.bf16.msra.mxu0 %v1587_v10 }
  0xce   : > { %1447 = vmatprep.subr.bf16.mxu0 %v1588_v11 }
  0xd1   : > { %1448 = vmatpush3.bf16.msra.mxu0 %v1588_v11 }
  0xd2   : > { %1449 = vmatprep.subr.bf16.mxu0 %v1589_v12 }
  0xd5   : > { %1450 = vmatpush3.bf16.msra.mxu0 %v1589_v12 }
  0xd6   : > { %1451 = vmatprep.subr.bf16.mxu0 %v1590_v13 }
  0xd9   : > { %1452 = vmatpush3.bf16.msra.mxu0 %v1590_v13 }
 0x18e   : > { %v638_v45 = vpop.f32.mrb[0].mxu0 }
 0x18f   : > { %v639_v46 = vadd.f32 %v638_v45, %v505_v43  ;;  %v640_v47 = vpop.f32.mrb[1].mxu0 }
 0x190   : > { %v641_v48 = vadd.f32 %v640_v47, %v509_v44  ;;  %v642_v49 = vpop.f32.mrb[2].mxu0 }
 0x191   : > { %v643_v50 = vadd.f32 %v642_v49, %v505_v43  ;;  %v644_v51 = vpop.f32.mrb[3].mxu0  ;;  %v657_v53 = vmax.f32 %v639_v46, 0.0 }
 0x192   : > { %v645_v52 = vadd.f32 %v644_v51, %v509_v44  ;;  %v658_v55 = vmax.f32 %v641_v48, 0.0 }
 0x193   : > { %v659_v54 = vmax.f32 %v643_v50, 0.0 }
 0x194   : > { %v660_v56 = vmax.f32 %v645_v52, 0.0 }
 0x195   : > { %v665_v57 = vpack.c.bf16 %v659_v54, %v657_v53 }
 0x196   : > { %v648_v58 = vpop.f32.mrb[4].mxu0  ;;  %v666_v59 = vpack.c.bf16 %v660_v56, %v658_v55 }
 0x197   : > { %v649_v60 = vadd.f32 %v648_v58, %v505_v43  ;;  %v650_v61 = vpop.f32.mrb[5].mxu0 }
 0x198   : > { %v651_v62 = vadd.f32 %v650_v61, %v509_v44  ;;  %v652_v63 = vpop.f32.mrb[6].mxu0  ;;  %836 = vmatprep.mubr.bf16.mxu1 %v666_v59 }
 0x199   : > { %v653_v0 = vadd.f32 %v652_v63, %v505_v43  ;;  %v654_v1 = vpop.f32.mrb[7].mxu0  ;;  %837 = vmatmul.mubr.bf16.vlgmr.msra.gmra.mrb[0].mxu1 %v665_v57  ;;  %v661_v3 = vmax.f32 %v649_v60, 0.0 }
 0x19a   : > { %v655_v2 = vadd.f32 %v654_v1, %v509_v44  ;;  %v662_v5 = vmax.f32 %v651_v62, 0.0 }
 0x19b   : > { %v663_v4 = vmax.f32 %v653_v0, 0.0 }
 0x19c   : > { %v664_v6 = vmax.f32 %v655_v2, 0.0 }
 0x19d   : > { %v667_v7 = vpack.c.bf16 %v663_v4, %v661_v3 }
 0x19e   : > { %v668_v8 = vpack.c.bf16 %v664_v6, %v662_v5 }
 0x1a0   : > { %844 = vmatprep.mubr.bf16.mxu1 %v668_v8 }
 0x1a1   : > { %845 = vmatmul.mubr.bf16.gmra.mrb[4].mxu1 %v667_v7 }
 0x26c   : > { %v1415_v14 = vpop.f32.mrb[0].mxu1 }
 0x26d   : > { %v1416_v16 = vpop.f32.mrb[1].mxu1 }
 0x26e   : > { %v1417_v17 = vadd.f32 %v1416_v16, %v1415_v14  ;;  %v1418_v18 = vpop.f32.mrb[2].mxu1 }
 0x26f   : > { %v1419_v19 = vpop.f32.mrb[3].mxu1 }
 0x270   : > { %v839_v20 = vadd.f32 %v1417_v17, %v1323_v15  ;;  %v1420_v21 = vadd.f32 %v1419_v19, %v1418_v18 }
 0x272   : > { %v842_v22 = vadd.f32 %v1420_v21, %v1323_v15  ;;  %v853_v23 = vmax.f32 %v839_v20, 0.0 }
 0x274   : > { %v854_v24 = vmax.f32 %v842_v22, 0.0  ;;  %v1421_v25 = vpop.f32.mrb[4].mxu1 }
 0x275   : > { %v1422_v26 = vpop.f32.mrb[5].mxu1 }
 0x276   : > { %v1423_v27 = vadd.f32 %v1422_v26, %v1421_v25  ;;  %v1424_v28 = vpop.f32.mrb[6].mxu1  ;;  %v857_v29 = vpack.c.bf16 %v854_v24, %v853_v23 }
 0x277   : > { %v1425_v30 = vpop.f32.mrb[7].mxu1 }
 0x278   : > { %v847_v31 = vadd.f32 %v1423_v27, %v1323_v15  ;;  %v1426_v32 = vadd.f32 %v1425_v30, %v1424_v28  ;;  %1453 = vmatprep.mubr.bf16.mxu0 %v857_v29 }
 0x27a   : > { %v850_v33 = vadd.f32 %v1426_v32, %v1323_v15  ;;  %v855_v34 = vmax.f32 %v847_v31, 0.0 }
 0x27c   : > { %v856_v35 = vmax.f32 %v850_v33, 0.0 }
 0x27e   : > { %v858_v36 = vpack.c.bf16 %v856_v35, %v855_v34 }
 0x280   : > { %1454 = vmatmul.mubr.bf16.vlgmr.msra.gmra.mrb[8].mxu0 %v858_v36 }
 0x351   : > { %982 = sbr.rel (%p1349_p4) target bundleno = 1180 (0x49c), region = 68 }
 0x353   : > { %v1455_v38 = vpop.f32.mrb[8].mxu0 }
 0x354   : > { %v2205_v39 = vadd.f32 %v1455_v38, %v1340_v37  ;;  %v964_v40 = vpop.f32.mrb[9].mxu0 }
 0x355   : > { %v965_v41 = vadd.f32 %v1340_v37, %v964_v40  ;;  %v1456_v42 = vpop.f32.mrb[10].mxu0 }
 0x356   : > { %v2207_v43 = vadd.f32 %v1456_v42, %v1340_v37  ;;  %v967_v44 = vpop.f32.mrb[11].mxu0  ;;  %987 = vmax.xlane.f32.xlu1 (!%p1349_p4), %v2205_v39 }
 0x357   : > { %v968_v45 = vadd.f32 %v1340_v37, %v967_v44  ;;  %983 = vmax.xlane.f32.xlu0 (!%p1349_p4), %v965_v41 }
 0x35a   : > { %989 = vmax.xlane.f32.xlu1 %v2207_v43 }
 0x35b   : > { %985 = vmax.xlane.f32.xlu0 %v968_v45 }
 0x3e3   : > { %v988_v47 = vpop.xlane.xlu1 %987 }
 0x3e4   : > { %v984_v46 = vpop.xlane.xlu0 %983  ;;  %v993_v49 = vsub.f32 %v2205_v39, %v988_v47 }
 0x3e5   : > { %v991_v48 = vsub.f32 %v965_v41, %v984_v46 }
 0x3e6   : > { %v999_v51 = vmul.f32 1.442695, %v993_v49 }
 0x3e7   : > { %v995_v50 = vmul.f32 1.442695, %v991_v48  ;;  %v990_v53 = vpop.xlane.xlu1 %989 }
 0x3e8   : > { %v986_v52 = vpop.xlane.xlu0 %985  ;;  %v994_v55 = vsub.f32 %v2207_v43, %v990_v53 }
 0x3e9   : > { %1591 = vpow2.f32 %v995_v50  ;;  %v992_v54 = vsub.f32 %v968_v45, %v986_v52 }
 0x3ea   : > { %1593 = vpow2.f32 %v999_v51  ;;  %v1001_v57 = vmul.f32 1.442695, %v994_v55 }
 0x3eb   : > { %v997_v56 = vmul.f32 1.442695, %v992_v54 }
 0x3ed   : > { %1595 = vpow2.f32 %v997_v56 }
 0x3ee   : > { %1597 = vpow2.f32 %v1001_v57 }
 0x3f3   : > { %v1592_v58 = vpop.eup %1591 }
 0x3f4   : > { %1003 = vadd.xlane.f32.xlu0 %v1592_v58  ;;  %v1594_v59 = vpop.eup %1593 }
 0x3f7   : > { %v1596_v60 = vpop.eup %1595 }
 0x3f8   : > { %1007 = vadd.xlane.f32.xlu0 %v1594_v59  ;;  %1005 = vadd.xlane.f32.xlu1 %v1596_v60  ;;  %v1598_v61 = vpop.eup %1597 }
 0x3fc   : > { %1009 = vadd.xlane.f32.xlu1 %v1598_v61 }
 0x481   : > { %v1004_v62 = vpop.xlane.xlu0 %1003 }
 0x482   : > { %1599 = vlog2.f32 %v1004_v62 }
 0x485   : > { %v1006_v63 = vpop.xlane.xlu1 %1005  ;;  %v1008_v0 = vpop.xlane.xlu0 %1007 }
 0x486   : > { %1601 = vlog2.f32 %v1006_v63 }
 0x487   : > { %1603 = vlog2.f32 %v1008_v0 }
 0x489   : > { %v1010_v1 = vpop.xlane.xlu1 %1009 }
 0x48a   : > { %1605 = vlog2.f32 %v1010_v1 }
 0x48c   : > { %v1600_v2 = vpop.eup %1599 }
 0x48d   : > { %v1012_v3 = vmul.f32 0.6931472, %v1600_v2 }
 0x48f   : > { %v1019_v7 = vsub.f32 %v991_v48, %v1012_v3 }
 0x490   : > { %v1602_v4 = vpop.eup %1601 }
 0x491   : > { %v1604_v5 = vpop.eup %1603  ;;  %v1014_v6 = vmul.f32 0.6931472, %v1602_v4 }
 0x492   : > { %v1016_v9 = vmul.f32 0.6931472, %v1604_v5 }
 0x493   : > { %v1020_v8 = vsub.f32 %v992_v54, %v1014_v6 }
 0x494   : > { %v1606_v10 = vpop.eup %1605  ;;  %v1021_v13 = vsub.f32 %v993_v49, %v1016_v9 }
 0x495   : > { %v1380_v11 = vpack.c.bf16 %v1020_v8, %v1019_v7  ;;  %v1018_v12 = vmul.f32 0.6931472, %v1606_v10 }
 0x497   : > { %1381 = vst [vmem:[%s2211_s17] sm:$0xff] %v1380_v11   ;;  %v1022_v14 = vsub.f32 %v994_v55, %v1018_v12 }
 0x499   : > { %v1385_v15 = vpack.c.bf16 %v1022_v14, %v1021_v13 }
 0x49b   : > { %1397 = vst [vmem:[%s2211_s17 + $0x8] sm:$0xff] %v1385_v15  }
 0x49c PF: > { %p1354_p10 = scmp.ne.s32.totalorder %s1817_s27, 1 }
 0x49d   : > { %v1047_v16 = vmul.f32 (!%p1354_p10), 0.5, %v965_v41  ;;  %v1048_v17 = vmul.f32 (!%p1354_p10), 0.5, %v968_v45  ;;  %v1049_v18 = vmul.f32 (!%p1354_p10), 0.5, %v2205_v39  ;;  %v1050_v19 = vmul.f32 (!%p1354_p10), 0.5, %v2207_v43 }
 0x49e   : > { %1046 = sbr.rel (%p1354_p10) target bundleno = 1204 (0x4b4), region = 72 }
 0x49f   : > { %1607 = vtanh.f32 (!%p1354_p10), %v1047_v16 }
 0x4a0   : > { %1609 = vtanh.f32 (!%p1354_p10), %v1048_v17 }
 0x4a1   : > { %1611 = vtanh.f32 (!%p1354_p10), %v1049_v18 }
 0x4a2   : > { %1613 = vtanh.f32 (!%p1354_p10), %v1050_v19 }
 0x4a9   : > { %v1608_v20 = vpop.eup %1607 }
 0x4aa   : > { %v1610_v21 = vpop.eup %1609  ;;  %v1055_v22 = vmul.f32 0.5, %v1608_v20 }
 0x4ab   : > { %v1612_v23 = vpop.eup %1611  ;;  %v1056_v24 = vmul.f32 0.5, %v1610_v21 }
 0x4ac   : > { %v1614_v25 = vpop.eup %1613  ;;  %v1059_v26 = vadd.f32 0.5, %v1055_v22  ;;  %v1057_v27 = vmul.f32 0.5, %v1612_v23 }
 0x4ad   : > { %v1060_v28 = vadd.f32 0.5, %v1056_v24  ;;  %v1058_v29 = vmul.f32 0.5, %v1614_v25 }
 0x4ae   : > { %v1061_v30 = vadd.f32 0.5, %v1057_v27 }
 0x4af   : > { %v1390_v31 = vpack.c.bf16 %v1060_v28, %v1059_v26  ;;  %v1062_v32 = vadd.f32 0.5, %v1058_v29 }
 0x4b1   : > { %1391 = vst [vmem:[%s2211_s17] sm:$0xff] %v1390_v31   ;;  %v1395_v33 = vpack.c.bf16 %v1062_v32, %v1061_v30 }
 0x4b3   : > { %1398 = vst [vmem:[%s2211_s17 + $0x8] sm:$0xff] %v1395_v33  }
 0x4b4 PF: > { %s1376_s9 = sshll.u32 %s1817_s27, 8  ;;  %s1099_s10 = sshll.u32 %s2211_s17, 4  ;;  %s2232_s10 = int_to_ptr.vmem [resolvable:$true] %s1099_s10 }
 0x4b5   : > { %s2229_s21 = scalar_lea.hbm %s2288_s7, %s1376_s9  ;;  %s1084_s18 = scalar_lea.sflag [#allocation4], %s2117_s15 }
 0x4b6   : > { %s1735_s23 = scalar_lea.vmem %s2232_s10, 256  ;;  %p2318_p11 = scmp.ne.s32.totalorder %s2306_s14, 0 }
 0x4b7   : > { %p1736_p13 = scmp.ne.s32.totalorder %s2232_s10, %s1735_s23  ;;  %s1836_s30 = smov [#allocation10]  }
 0x4b8   : > { %s1739_s13 = sshll.u32 %s1836_s30, 4  ;;  %s1740_s13 = int_to_ptr.vmem [resolvable:$false] %s1739_s13 }
 0x4b9   : > { %p1737_p7 = pnand %p1736_p13, %p2318_p11  ;;  %s1741_s27 = scalar_lea.vmem %s1740_s13, 512 }
 0x4ba   : > { %p1742_p5 = scmp.lt.s32.totalorder %s2232_s10, %s1740_s13  ;;  %p1743_p1 = scmp.lt.s32.totalorder %s1741_s27, %s1735_s23 }
 0x4bb   : > { %p1738_p3 = pneg %p1737_p7 }
 0x4bc   : > { %p1744_p6 = por %p1743_p1, %p1742_p5 }
 0x4be   : > { %p1745_p9 = pnand %p1744_p6, %p1738_p3 }
 0x4c0   : > { %1748 = shalt.err (!%p1745_p9)
}
 0x4c1   : > { %s1749_s24 = scalar_lea.hbm %s2229_s21, 256  ;;  %s1753_s1 = scalar_lea.hbm %s2288_s7, 512 }
 0x4c2   : > { %p1750_p12 = scmp.ne.s32.totalorder %s2229_s21, %s1749_s24  ;;  %p1754_p0 = scmp.lt.u32.totalorder %s2229_s21, %s2288_s7 }
 0x4c3   : > { %p1755_p4 = scmp.lt.u32.totalorder %s1753_s1, %s1749_s24  ;;  %p1757_p13 = scmp.lt.u32.totalorder %s1749_s24, %s2229_s21 }
 0x4c4   : > { %p1751_p2 = pnand %p1750_p12, %p2318_p11 }
 0x4c5   : > { %p1756_p10 = por %p1755_p4, %p1754_p0 }
 0x4c6   : > { %p1752_p8 = pneg %p1751_p2 }
 0x4c7   : > { %p1758_p7 = por %p1757_p13, %p1756_p10 }
 0x4c9   : > { %p1759_p3 = pnand %p1758_p7, %p1752_p8 }
 0x4cb   : > { %1762 = shalt.err (!%p1759_p3)
}
 0x4cc   : > { %s1837_s20 = smov 64   ;;  %s1838_s11 = smov 4  }
 0x4cd   : > { %1465 = dma.vmem_to_hbm [thread:$0]  (%p2318_p11), %s2232_s10, 256, %s2229_s21, %s1084_s18, %s1837_s20, %s1837_s20, %s1838_s11  }
 0x4ce PF: > { %s2319_s16 = sld [smem:[#allocation15_spill]]  ;;  %s2320_s17 = sld [smem:[#allocation20_spill]] }
 0x4cf   : > { %s2321_s9 = sld [smem:[#allocation17_spill]] }
 0x4d4   : > { %s1114_s22 = sand.u32 1, %s2319_s16   ;;  %p2322_p5 = scmp.ne.s32.totalorder %s2320_s17, 0 }
 0x4d5   : > { %p2323_p1 = scmp.ge.s32.totalorder %s2321_s9, 2  ;;  %s1115_s12 = scalar_lea.sflag [#allocation4], %s1114_s22 }
 0x4d7   : > { %p1481_p6 = pnand %p2323_p1, %p2322_p5 }
 0x4d9   : > { %1800 = dma.done.wait (!%p1481_p6), %s1115_s12, 256  }
 0x4da   : > { %1802 = vsyncadd (!%p1481_p6), %s1115_s12, 4294967040  ;;  %s29_s29 = sadd.s32 1, %s2321_s9   ;;  %s2324_s23 = sld [smem:[#allocation16_spill]] }
 0x4db   : > { %p26_p9 = scmp.ge.s32.totalorder %s29_s29, 4   ;;  %s2325_s26 = sld [smem:[#allocation19_spill]] }
 0x4dc   : > { %s2326_s14 = sld [smem:[#allocation18_spill]]  ;;  %s2327_s24 = smov %s1809_s25 }
 0x4dd   : > { %s2329_s27 = smov %s1821_s28  ;;  %28 = sbr.rel (!%p26_p9) target bundleno = 12 (0xc), region = 147 }
 0x4e0   : > { %s2328_s25 = smov %s2324_s23 }
 0x4e2   : > { %s2330_s28 = smov %s2326_s14 }
 0x4e4   :  { %1120 = vsyncpa [#allocation3], 1 }
 0x4e5   :  { %1122 = vsyncpa [#allocation3 + $0x1], 1 }
 0x4e6   :  { %1123 = vsyncpa [#allocation6], 1 }
 0x4e7   :  { %1125 = vsyncpa [#allocation6 + $0x1], 1 }
 0x4e8   :  { %1126 = vsyncpa [#allocation9], 1 }
 0x4e9   :  { %1128 = vsyncpa [#allocation9 + $0x1], 1 }
 0x4ea   :  { %1129 = vsyncpa [#allocation4], 1 }
 0x4eb   :  { %1131 = vsyncpa [#allocation4 + $0x1], 1 }

</bundles_post_ra>
